<compile_context>
chip_gen: v6e
topology: v6e:2x2x1
jax: 0.10.0
libtpu: 0.0.40
codegen_flags: <defaults>
</compile_context>

<pallas_src>
import functools

import jax
import jax.numpy as jnp
from jax.experimental import pallas as pl
from jax.experimental.pallas import tpu as pltpu


def _round_up(v, m):
    return (v + m - 1) // m * m


def _budgets():
    """(target block bytes, scoped vmem limit bytes), generation-aware."""
    vmem = None
    try:
        vmem = getattr(pltpu.get_tpu_info(), "vmem_capacity_bytes", None)
    except Exception:
        vmem = None
    if vmem is not None and vmem >= 100 * 1024 * 1024:
        # v5e / v6e: 128 MiB physical VMEM -> bigger streamed tiles.
        return 8 * 1024 * 1024, 64 * 1024 * 1024
    # v7x (64 MiB physical) or unknown: keep 2 in-bufs + 2 out-bufs <= ~24 MiB.
    return 6 * 1024 * 1024, 40 * 1024 * 1024


def _choose_tiles(B, F, itemsize, target_bytes, min_batch_blocks=1):
    """Pick a lane-dense (tb, tf) block of ~target_bytes.

    tf is either F (full feature dim -> always a legal block dim) or, for very
    wide F, a multiple of 128.  tb is a multiple of 8 or the full batch dim.
    """
    lane_bytes = _round_up(F, 128) * itemsize
    if 8 * lane_bytes <= target_bytes:
        tf = F                                                # full width
        tb = max(8, (target_bytes // lane_bytes) // 8 * 8)
    else:
        # Very wide F: tile the feature axis too (multiple of 128).
        tf = max(128, (target_bytes // (8 * itemsize)) // 128 * 128)
        tf = min(tf, F // 128 * 128)
        tb = 8
    if min_batch_blocks > 1:
        # Ensure several batch blocks so "parallel" can shard across v7x's 2 TCs.
        tb = min(tb, max(8, _round_up(-(-B // min_batch_blocks), 8)))
    if tb >= B:
        tb = B                                                # single (full-dim) block
    return tb, tf


# ---------------- Pallas kernels ----------------

def _stats_kernel(x_ref, m_ref, b_ref, *, n_rows, tb):
    """Reduction over batch tiles: accumulate sum / sum-of-squares per feature,
    finalize to m = 1/std, b = -mean/std on the last batch step.

    m_ref / b_ref are the resident (1, tf) output blocks (same block index for
    every batch step) and double as the f32 accumulators."""
    bi = pl.program_id(1)

    @pl.when(bi == 0)
    def _():
        m_ref[...] = jnp.zeros_like(m_ref)
        b_ref[...] = jnp.zeros_like(b_ref)

    x = x_ref[...].astype(jnp.float32)                        # (tb, tf)
    # Mask rows of the ragged last batch block (OOB reads are undefined).
    row = bi * tb + jax.lax.broadcasted_iota(jnp.int32, x.shape, 0)
    xv = jnp.where(row < n_rows, x, 0.0)
    m_ref[...] += jnp.sum(xv, axis=0, keepdims=True)          # running sum
    b_ref[...] += jnp.sum(xv * xv, axis=0, keepdims=True)     # running sum of squares

    @pl.when(bi == pl.num_programs(1) - 1)
    def _():
        n = jnp.float32(n_rows)
        mean = m_ref[...] / n
        # torch.std is unbiased (ddof=1); n_rows==1 yields NaN, matching PyTorch.
        var = (b_ref[...] - n * mean * mean) / (n - 1.0)
        var = jnp.maximum(var, 0.0)                           # clamp cancellation noise
        # std[std == 0] = 1e-6  ->  m = 1e6, b = -mean * 1e6 on those features.
        inv_std = jnp.where(var == 0.0, jnp.float32(1.0e6), jax.lax.rsqrt(var))
        m_ref[...] = inv_std
        b_ref[...] = -mean * inv_std


def _apply_kernel(x_ref, m_ref, b_ref, y_ref):
    """One (tb, tf) tile: y = m * x + b, computed in f32 (free under HBM bound)."""
    x = x_ref[...].astype(jnp.float32)
    y_ref[...] = (x * m_ref[...] + b_ref[...]).astype(y_ref.dtype)


# ---------------- wrappers ----------------

def linear_transform_apply(x, m, b):
    """forward() on an already-initialized module: y = m * x + b."""
    B, F = x.shape
    itemsize = jnp.dtype(x.dtype).itemsize
    target_bytes, vmem_limit = _budgets()
    tb, tf = _choose_tiles(B, F, itemsize, target_bytes, min_batch_blocks=4)
    nb, nf = pl.cdiv(B, tb), pl.cdiv(F, tf)

    m2 = m.reshape(1, F).astype(jnp.float32)
    b2 = b.reshape(1, F).astype(jnp.float32)

    return pl.pallas_call(
        _apply_kernel,
        out_shape=jax.ShapeDtypeStruct((B, F), x.dtype),
        grid=(nb, nf),
        in_specs=[
            pl.BlockSpec((tb, tf), lambda i, j: (i, j)),   # streamed x tiles
            pl.BlockSpec((1, tf), lambda i, j: (0, j)),    # m: one fetch per feature tile
            pl.BlockSpec((1, tf), lambda i, j: (0, j)),    # b
        ],
        out_specs=pl.BlockSpec((tb, tf), lambda i, j: (i, j)),
        compiler_params=pltpu.CompilerParams(
            dimension_semantics=("parallel", "parallel"),  # shards across v7x TCs
            vmem_limit_bytes=vmem_limit,
        ),
        cost_estimate=pl.CostEstimate(
            flops=2 * B * F,
            transcendentals=0,
            bytes_accessed=2 * B * F * itemsize + 2 * F * 4,
        ),
    )(x, m2, b2)


def linear_transform_init_and_apply(x):
    """forward() on an uninitialized module. Returns (y, m, b)."""
    B, F = x.shape
    itemsize = jnp.dtype(x.dtype).itemsize
    target_bytes, vmem_limit = _budgets()
    tb, tf = _choose_tiles(B, F, itemsize, target_bytes)
    nb, nf = pl.cdiv(B, tb), pl.cdiv(F, tf)

    kernel = functools.partial(_stats_kernel, n_rows=B, tb=tb)
    m2, b2 = pl.pallas_call(
        kernel,
        out_shape=(
            jax.ShapeDtypeStruct((1, F), jnp.float32),     # m
            jax.ShapeDtypeStruct((1, F), jnp.float32),     # b
        ),
        grid=(nf, nb),                                     # reduction (batch) axis last
        in_specs=[pl.BlockSpec((tb, tf), lambda fi, bi: (bi, fi))],
        out_specs=(
            pl.BlockSpec((1, tf), lambda fi, bi: (0, fi)),  # resident accumulator
            pl.BlockSpec((1, tf), lambda fi, bi: (0, fi)),
        ),
        compiler_params=pltpu.CompilerParams(
            dimension_semantics=("parallel", "arbitrary"),
            vmem_limit_bytes=vmem_limit,
        ),
    )(x)

    m = m2[0]
    b = b2[0]
    y = linear_transform_apply(x, m, b)                     # streamed affine pass
    return y, m, b


# ---------------- demo / correctness check ----------------

if __name__ == "__main__":
    key = jax.random.PRNGKey(0)

    def reference(x):
        mean = jnp.mean(x, axis=0)
        std = jnp.std(x, axis=0, ddof=1)
        std = jnp.where(std == 0.0, 1e-6, std)
        m_r = 1.0 / std
        b_r = -mean / std
        return m_r * x + b_r, m_r, b_r

    # --- aligned small shape ---
    B, F = 8, 128
    x = jax.random.normal(key, (B, F), dtype=jnp.float32) * 3.0 + 1.5

    y, m_new, b_new = linear_transform_init_and_apply(x)     # first forward (init)
    jax.block_until_ready((y, m_new, b_new))
    y_ref, m_ref, b_ref = reference(x)
    assert jnp.allclose(y, y_ref, atol=1e-4, rtol=1e-4)
    assert jnp.allclose(m_new, m_ref, atol=1e-4, rtol=1e-4)
    assert jnp.allclose(b_new, b_ref, atol=1e-4, rtol=1e-4)

    y2 = linear_transform_apply(x, m_new, b_new)              # second forward (affine)
    jax.block_until_ready(y2)
    assert jnp.allclose(y2, y_ref, atol=1e-4, rtol=1e-4)
    assert jnp.allclose(jnp.mean(y, axis=0), 0.0, atol=1e-4)  # standardized output

    # --- unaligned shape (ragged blocks, no wrapper padding) + std==0 column ---
    B2, F2 = 10, 200
    x2 = jax.random.normal(jax.random.PRNGKey(1), (B2, F2), dtype=jnp.float32) * 2.0 - 0.7
    x2 = x2.at[:, 7].set(0.5)                                  # constant column -> std==0 branch
    y3, m3, b3 = linear_transform_init_and_apply(x2)
    y4 = linear_transform_apply(x2, m3, b3)
    jax.block_until_ready((y3, y4))
    y2_ref, m2_ref, b2_ref = reference(x2)
    assert jnp.allclose(y3, y2_ref, atol=1e-4, rtol=1e-4)
    assert jnp.allclose(m3, m2_ref, atol=1e-4, rtol=1e-4)
    assert jnp.allclose(b3, b2_ref, atol=1e-4, rtol=1e-4)
    assert jnp.allclose(y4, y2_ref, atol=1e-4, rtol=1e-4)

    print("KERNEL_OK")
</pallas_src>

<mosaic_0001>
module attributes {stable_mosaic.version = 11 : i64} {
  func.func @_stats_kernel(%arg0: i32, %arg1: i32, %arg2: memref<8x128xf32, #tpu.memory_space<vmem>>, %arg3: memref<1x128xf32, #tpu.memory_space<vmem>>, %arg4: memref<1x128xf32, #tpu.memory_space<vmem>>) attributes {dimension_semantics = [#tpu.dimension_semantics<parallel>, #tpu.dimension_semantics<arbitrary>], iteration_bounds = array<i64: 1, 1>, scalar_prefetch = 0 : i64, scratch_operands = 0 : i64, tpu.core_type = #tpu.core_type<tc>, window_params = [{transform_indices = @transform_0, window_bounds = array<i64: 8, 128>}, {transform_indices = @transform_1, window_bounds = array<i64: 1, 128>}, {transform_indices = @transform_2, window_bounds = array<i64: 1, 128>}]} {
    %c0_i32 = arith.constant 0 : i32
    %0 = arith.cmpi eq, %arg1, %c0_i32 : i32
    %1 = arith.extui %0 : i1 to i32
    %c0_i32_0 = arith.constant 0 : i32
    %2 = arith.cmpi ne, %1, %c0_i32_0 : i32
    scf.if %2 {
      %cst_15 = arith.constant 0.000000e+00 : f32
      %26 = vector.broadcast %cst_15 : f32 to vector<1x128xf32>
      %c0_16 = arith.constant 0 : index
      %c0_17 = arith.constant 0 : index
      %27 = vector.load %arg3[%c0_16, %c0_17] : memref<1x128xf32, #tpu.memory_space<vmem>>, vector<1x128xf32>
      tpu.vector_store %arg3[%c0_16, %c0_17], %26 {strides = array<i32>} : memref<1x128xf32, #tpu.memory_space<vmem>>, vector<1x128xf32>,
      %cst_18 = arith.constant 0.000000e+00 : f32
      %28 = vector.broadcast %cst_18 : f32 to vector<1x128xf32>
      %c0_19 = arith.constant 0 : index
      %c0_20 = arith.constant 0 : index
      %29 = vector.load %arg4[%c0_19, %c0_20] : memref<1x128xf32, #tpu.memory_space<vmem>>, vector<1x128xf32>
      tpu.vector_store %arg4[%c0_19, %c0_20], %28 {strides = array<i32>} : memref<1x128xf32, #tpu.memory_space<vmem>>, vector<1x128xf32>,
    } else {
    }
    %c0 = arith.constant 0 : index
    %c0_1 = arith.constant 0 : index
    %3 = vector.load %arg2[%c0, %c0_1] : memref<8x128xf32, #tpu.memory_space<vmem>>, vector<8x128xf32>
    %c8_i32 = arith.constant 8 : i32
    %4 = arith.muli %arg1, %c8_i32 : i32
    %5 = tpu.iota {dimensions = array<i32: 0>} : vector<8x128xi32>
    %6 = vector.broadcast %4 : i32 to vector<8x128xi32>
    %7 = arith.addi %6, %5 : vector<8x128xi32>
    %c8_i32_2 = arith.constant 8 : i32
    %8 = vector.broadcast %c8_i32_2 : i32 to vector<8x128xi32>
    %9 = arith.cmpi slt, %7, %8 : vector<8x128xi32>
    %cst = arith.constant 0.000000e+00 : f32
    %10 = vector.broadcast %cst : f32 to vector<8x128xf32>
    %11 = arith.select %9, %3, %10 : vector<8x128xi1>, vector<8x128xf32>
    %c0_3 = arith.constant 0 : index
    %c0_4 = arith.constant 0 : index
    %12 = vector.load %arg3[%c0_3, %c0_4] : memref<1x128xf32, #tpu.memory_space<vmem>>, vector<1x128xf32>
    %cst_5 = arith.constant dense<0.000000e+00> : vector<128xf32>
    %13 = vector.multi_reduction <add>, %11, %cst_5 [0] : vector<8x128xf32> to vector<128xf32>
    %14 = vector.shape_cast %13 : vector<128xf32> to vector<1x128xf32>
    %15 = arith.addf %12, %14 : vector<1x128xf32>
    %c0_6 = arith.constant 0 : index
    %c0_7 = arith.constant 0 : index
    %16 = vector.load %arg3[%c0_6, %c0_7] : memref<1x128xf32, #tpu.memory_space<vmem>>, vector<1x128xf32>
    tpu.vector_store %arg3[%c0_6, %c0_7], %15 {strides = array<i32>} : memref<1x128xf32, #tpu.memory_space<vmem>>, vector<1x128xf32>,
    %c0_8 = arith.constant 0 : index
    %c0_9 = arith.constant 0 : index
    %17 = vector.load %arg4[%c0_8, %c0_9] : memref<1x128xf32, #tpu.memory_space<vmem>>, vector<1x128xf32>
    %18 = arith.mulf %11, %11 : vector<8x128xf32>
    %cst_10 = arith.constant dense<0.000000e+00> : vector<128xf32>
    %19 = vector.multi_reduction <add>, %18, %cst_10 [0] : vector<8x128xf32> to vector<128xf32>
    %20 = vector.shape_cast %19 : vector<128xf32> to vector<1x128xf32>
    %21 = arith.addf %17, %20 : vector<1x128xf32>
    %c0_11 = arith.constant 0 : index
    %c0_12 = arith.constant 0 : index
    %22 = vector.load %arg4[%c0_11, %c0_12] : memref<1x128xf32, #tpu.memory_space<vmem>>, vector<1x128xf32>
    tpu.vector_store %arg4[%c0_11, %c0_12], %21 {strides = array<i32>} : memref<1x128xf32, #tpu.memory_space<vmem>>, vector<1x128xf32>,
    %c0_i32_13 = arith.constant 0 : i32
    %23 = arith.cmpi eq, %arg1, %c0_i32_13 : i32
    %24 = arith.extui %23 : i1 to i32
    %c0_i32_14 = arith.constant 0 : i32
    %25 = arith.cmpi ne, %24, %c0_i32_14 : i32
    scf.if %25 {
      %c0_15 = arith.constant 0 : index
      %c0_16 = arith.constant 0 : index
      %26 = vector.load %arg3[%c0_15, %c0_16] : memref<1x128xf32, #tpu.memory_space<vmem>>, vector<1x128xf32>
      %cst_17 = arith.constant 8.000000e+00 : f32
      %27 = vector.broadcast %cst_17 : f32 to vector<1x128xf32>
      %28 = arith.divf %26, %27 : vector<1x128xf32>
      %c0_18 = arith.constant 0 : index
      %c0_19 = arith.constant 0 : index
      %29 = vector.load %arg4[%c0_18, %c0_19] : memref<1x128xf32, #tpu.memory_space<vmem>>, vector<1x128xf32>
      %cst_20 = arith.constant 8.000000e+00 : f32
      %30 = vector.broadcast %cst_20 : f32 to vector<1x128xf32>
      %31 = arith.mulf %30, %28 : vector<1x128xf32>
      %32 = arith.mulf %31, %28 : vector<1x128xf32>
      %33 = arith.subf %29, %32 : vector<1x128xf32>
      %cst_21 = arith.constant 8.000000e+00 : f32
      %cst_22 = arith.constant 1.000000e+00 : f32
      %34 = arith.subf %cst_21, %cst_22 : f32
      %35 = vector.broadcast %34 : f32 to vector<1x128xf32>
      %36 = arith.divf %33, %35 : vector<1x128xf32>
      %cst_23 = arith.constant 0.000000e+00 : f32
      %37 = vector.broadcast %cst_23 : f32 to vector<1x128xf32>
      %38 = arith.maximumf %36, %37 : vector<1x128xf32>
      %cst_24 = arith.constant 0.000000e+00 : f32
      %39 = vector.broadcast %cst_24 : f32 to vector<1x128xf32>
      %40 = arith.cmpf oeq, %38, %39 : vector<1x128xf32>
      %41 = math.rsqrt %38 : vector<1x128xf32>
      %cst_25 = arith.constant 1.000000e+06 : f32
      %42 = vector.broadcast %cst_25 : f32 to vector<1x128xf32>
      %43 = arith.select %40, %42, %41 : vector<1x128xi1>, vector<1x128xf32>
      %c0_26 = arith.constant 0 : index
      %c0_27 = arith.constant 0 : index
      %44 = vector.load %arg3[%c0_26, %c0_27] : memref<1x128xf32, #tpu.memory_space<vmem>>, vector<1x128xf32>
      tpu.vector_store %arg3[%c0_26, %c0_27], %43 {strides = array<i32>} : memref<1x128xf32, #tpu.memory_space<vmem>>, vector<1x128xf32>,
      %cst_28 = arith.constant 0.000000e+00 : f32
      %45 = vector.broadcast %cst_28 : f32 to vector<1x128xf32>
      %46 = arith.subf %45, %28 : vector<1x128xf32>
      %47 = arith.mulf %46, %43 : vector<1x128xf32>
      %c0_29 = arith.constant 0 : index
      %c0_30 = arith.constant 0 : index
      %48 = vector.load %arg4[%c0_29, %c0_30] : memref<1x128xf32, #tpu.memory_space<vmem>>, vector<1x128xf32>
      tpu.vector_store %arg4[%c0_29, %c0_30], %47 {strides = array<i32>} : memref<1x128xf32, #tpu.memory_space<vmem>>, vector<1x128xf32>,
    } else {
    }
    return
  }
  func.func @transform_0(%arg0: i32, %arg1: i32) -> (i32, i32) {
    %c0_i32 = arith.constant 0 : i32
    return %arg1, %arg0 : i32, i32
  }
  func.func @transform_1(%arg0: i32, %arg1: i32) -> (i32, i32) {
    %c0_i32 = arith.constant 0 : i32
    %c0_i32_0 = arith.constant 0 : i32
    return %c0_i32, %arg0 : i32, i32
  }
  func.func @transform_2(%arg0: i32, %arg1: i32) -> (i32, i32) {
    %c0_i32 = arith.constant 0 : i32
    %c0_i32_0 = arith.constant 0 : i32
    return %c0_i32, %arg0 : i32, i32
  }
}

</mosaic_0001>

<bundles_post_ra>
// kernel: tpu_custom_call.1
= control target key start
LH: loop header
LB: loop body
LE: loop exit
PB: predicated region body
PF: predicated region fallthrough
CT: control target
= control target key end

     0   :  { %8 = vsyncpa [#allocation3], 0  ;;  %s206_s0 = inlined_call_operand.hbm [shape: f32[8,128], index: 0, kind: input, shape index: {}]   ;;  %s207_s1 = inlined_call_operand.hbm [shape: f32[1,128], index: 1, kind: output, shape index: {0}]   ;;  %s208_s2 = inlined_call_operand.hbm [shape: f32[1,128], index: 2, kind: output, shape index: {1}]  }
   0x1   :  { %9 = vsyncpa [#allocation4], 0 }
   0x2   :  { %10 = vsyncpa [#allocation7], 0  ;;  %s178_s9 = smov [#allocation2]  }
   0x3   :  { %s17_s10 = sshll.u32 %s178_s9, 4  ;;  %s18_s10 = int_to_ptr.vmem [resolvable:$true] %s17_s10 }
   0x4   :  { %s120_s11 = scalar_lea.vmem %s18_s10, 128  ;;  %p125_p1 = scmp.lt.s32.totalorder %s18_s10, %s18_s10 }
   0x5   :  { %p121_p0 = scmp.ne.s32.totalorder %s18_s10, %s120_s11  ;;  %p126_p2 = scmp.lt.s32.totalorder %s120_s11, %s120_s11 }
   0x7   :  { %p127_p3 = por %p126_p2, %p125_p1 }
   0x9   :  { %p128_p4 = pnand %p127_p3, %p121_p0 }
   0xb   :  { %131 = shalt.err (!%p128_p4)
}
   0xc   :  { %20 = dma.hbm_to_vmem [thread:$0]  %s206_s0, 128, %s18_s10, [#allocation3]  }
   0xd   :  { %172 = dma.done.wait [#allocation3], 128  }
   0xe   :  { %173 = vsyncadd [#allocation3], 4294967168  ;;  %v179_v0 = vmov 0.0   ;;  %v30_v1 = vld [vmem:[#allocation2] sm:$0xff]  ;;  %s180_s0 = smov [#allocation5]   ;;  %s181_s15 = smov [#allocation6]  }
   0xf   :  { %28 = vst [vmem:[#allocation5] sm:$0x1] %v179_v0  ;;  %29 = vst [vmem:[#allocation6] sm:$0x1] %v179_v0  ;;  %v39_v2 = vrot.slane %v30_v1, 4  ;;  %v48_v3 = vmul.f32 %v30_v1, %v30_v1  ;;  %s83_s14 = sshll.u32 %s180_s0, 4  ;;  %s84_s14 = int_to_ptr.vmem [resolvable:$true] %s83_s14 }
  0x10   :  { %s93_s16 = sshll.u32 %s181_s15, 4  ;;  %s132_s17 = scalar_lea.vmem %s84_s14, 16  ;;  %s94_s16 = int_to_ptr.vmem [resolvable:$true] %s93_s16 }
  0x11   :  { %v40_v4 = vadd.f32 %v39_v2, %v30_v1  ;;  %v49_v5 = vrot.slane %v48_v3, 4  ;;  %p133_p5 = scmp.ne.s32.totalorder %s84_s14, %s132_s17  ;;  %s136_s18 = scalar_lea.vmem %s84_s14, 32 }
  0x12   :  { %p137_p6 = scmp.lt.s32.totalorder %s84_s14, %s84_s14  ;;  %p138_p7 = scmp.lt.s32.totalorder %s136_s18, %s132_s17 }
  0x13   :  { %v41_v6 = vrot.slane %v40_v4, 2  ;;  %v50_v7 = vadd.f32 %v49_v5, %v48_v3 }
  0x14   :  { %p139_p8 = por %p138_p7, %p137_p6 }
  0x15   :  { %v42_v8 = vadd.f32 %v41_v6, %v40_v4  ;;  %v51_v9 = vrot.slane %v50_v7, 2 }
  0x16   :  { %v38_v12 = vld [vmem:[#allocation5] sm:$0x1]  ;;  %v47_v15 = vld [vmem:[#allocation6] sm:$0x1]  ;;  %p140_p9 = pnand %p139_p8, %p133_p5 }
  0x17   :  { %v43_v10 = vrot.slane %v42_v8, 1  ;;  %v52_v11 = vadd.f32 %v51_v9, %v50_v7 }
  0x19   :  { %v44_v13 = vadd.f32 %v43_v10, %v42_v8  ;;  %v53_v14 = vrot.slane %v52_v11, 1 }
  0x1b   :  { %v45_v16 = vadd.f32 %v44_v13, %v38_v12  ;;  %v54_v17 = vadd.f32 %v53_v14, %v52_v11 }
  0x1d   :  { %46 = vst [vmem:[#allocation5] sm:$0x1] %v45_v16  ;;  %v55_v18 = vadd.f32 %v54_v17, %v47_v15 }
  0x1f   :  { %56 = vst [vmem:[#allocation6] sm:$0x1] %v55_v18 }
  0x24   :  { %v60_v19 = vld [vmem:[#allocation5] sm:$0x1] }
  0x25   :  { %v62_v20 = vmul.f32 0.125, %v60_v19 }
  0x26   :  { %v63_v22 = vld [vmem:[#allocation6] sm:$0x1] }
  0x27   :  { %v64_v21 = vmul.f32 8.0, %v62_v20  ;;  %v74_v28 = vsub.f32 0.0, %v62_v20 }
  0x29   :  { %v65_v23 = vmul.f32 %v64_v21, %v62_v20 }
  0x2b   :  { %v66_v24 = vsub.f32 %v63_v22, %v65_v23 }
  0x2d   :  { %v68_v25 = vmul.f32 0.14285715, %v66_v24 }
  0x2f   :  { %v69_v26 = vmax.f32 %v68_v25, 0.0 }
  0x31   :  { %110 = vrsqrt.f32 %v69_v26  ;;  %vm70_vm0 = vcmp.eq.f32.partialorder %v69_v26, 0.0 }
  0x3e   :  { %v111_v27 = vpop.eup %110 }
  0x3f   :  { %v72_v29 = vsel %vm70_vm0, 1000000.0, %v111_v27 }
  0x40   :  { %73 = vst [vmem:[#allocation5] sm:$0x1] %v72_v29  ;;  %v75_v30 = vmul.f32 %v74_v28, %v72_v29 }
  0x41   :  { %143 = shalt.err (!%p140_p9)
}
  0x42   :  { %86 = dma.vmem_to_hbm [thread:$0]  %s84_s14, 16, %s207_s1, [#allocation4]   ;;  %76 = vst [vmem:[#allocation6] sm:$0x1] %v75_v30 }
  0x43   :  { %s152_s21 = scalar_lea.vmem %s94_s16, 16  ;;  %s156_s22 = scalar_lea.vmem %s94_s16, 32 }
  0x44   :  { %p153_p10 = scmp.ne.s32.totalorder %s94_s16, %s152_s21  ;;  %p157_p11 = scmp.lt.s32.totalorder %s94_s16, %s94_s16 }
  0x45   :  { %p158_p12 = scmp.lt.s32.totalorder %s156_s22, %s152_s21 }
  0x47   :  { %p159_p13 = por %p158_p12, %p157_p11 }
  0x49   :  { %p160_p0 = pnand %p159_p13, %p153_p10 }
  0x4b   :  { %163 = shalt.err (!%p160_p0)
}
  0x4c   :  { %96 = dma.vmem_to_hbm [thread:$0]  %s94_s16, 16, %s208_s2, [#allocation7]  }
  0x4d   :  { %174 = dma.done.wait [#allocation4], 16  }
  0x4e   :  { %175 = vsyncadd [#allocation4], 4294967280 }
  0x4f   :  { %176 = dma.done.wait [#allocation7], 16  }
  0x50   :  { %177 = vsyncadd [#allocation7], 4294967280 }
  0x51   :  { %103 = vsyncpa [#allocation3], 1 }
  0x52   :  { %104 = vsyncpa [#allocation4], 1 }
  0x53   :  { %105 = vsyncpa [#allocation7], 1 }

</bundles_post_ra>
